<compile_context>
chip_gen: v6e
topology: v6e:2x2x1
jax: 0.10.0
libtpu: 0.0.40
codegen_flags: <defaults>
</compile_context>

<pallas_src>
import jax
import jax.numpy as jnp
from jax import lax
from jax.experimental import pallas as pl
from jax.experimental.pallas import tpu as pltpu


_LN_EPS = 1e-5  # PyTorch nn.LayerNorm default eps


def _layer_norm_kernel(x_ref, gamma_ref, beta_ref, out_ref):
    """Row-wise LayerNorm over the last (feature) axis of a (TM, D) tile."""
    x = x_ref[...]                                      # (TM, D) f32
    mean = jnp.mean(x, axis=-1, keepdims=True)
    xc = x - mean
    var = jnp.mean(xc * xc, axis=-1, keepdims=True)     # biased var (PyTorch)
    inv = lax.rsqrt(var + _LN_EPS)                      # EUP rsqrt, free slot
    out_ref[...] = (xc * inv) * gamma_ref[...] + beta_ref[...]


def _pick_row_tile(m):
    """Large row tile (mem-bound kernel); must be a multiple of 8 or == m."""
    if m % 8 != 0:
        return m                      # full-extent block is always legal
    tm = min(1024, m)
    return max(8, (tm // 8) * 8)


def layer_norm_pallas(x, gamma, beta):
    """LayerNorm over the last axis of x, implemented with pallas_call."""
    orig_shape = x.shape
    d = orig_shape[-1]
    m = 1
    for s in orig_shape[:-1]:
        m *= s

    x2d = x.reshape(m, d).astype(jnp.float32)
    g2d = gamma.reshape(1, d).astype(jnp.float32)
    b2d = beta.reshape(1, d).astype(jnp.float32)

    tm = _pick_row_tile(m)
    grid = (pl.cdiv(m, tm),)

    y2d = pl.pallas_call(
        _layer_norm_kernel,
        out_shape=jax.ShapeDtypeStruct((m, d), jnp.float32),
        grid_spec=pltpu.PrefetchScalarGridSpec(
            num_scalar_prefetch=0,
            grid=grid,
            in_specs=[
                pl.BlockSpec((tm, d), lambda i: (i, 0)),   # row tile of x
                pl.BlockSpec((1, d), lambda i: (0, 0)),    # gamma, VMEM-resident
                pl.BlockSpec((1, d), lambda i: (0, 0)),    # beta,  VMEM-resident
            ],
            out_specs=pl.BlockSpec((tm, d), lambda i: (i, 0)),
        ),
        compiler_params=pltpu.CompilerParams(
            dimension_semantics=("parallel",),             # megacore row-sharding
        ),
    )(x2d, g2d, b2d)

    return y2d.reshape(orig_shape)


def layer_normal_forward(x, gamma, beta, fn=None):
    """Pallas equivalent of Layer_Normal.forward: fn(LayerNorm(x))."""
    y = layer_norm_pallas(x, gamma, beta)
    # TODO(synk): `fn` is an arbitrary wrapped nn.Module in the PyTorch spec;
    # it is applied here as a plain JAX callable, not fused into the kernel.
    if fn is not None:
        y = fn(y)
    return y


if __name__ == "__main__":
    hidden = 32
    b, l = 2, 8

    key = jax.random.PRNGKey(0)
    key, kx, kg, kb, kw, kbias = jax.random.split(key, 6)

    x = jax.random.normal(kx, (b, l, hidden), jnp.float32)
    # LayerNorm affine params (PyTorch inits weight=1, bias=0; perturb so the
    # affine path is actually exercised by the check).
    gamma = 1.0 + 0.1 * jax.random.normal(kg, (hidden,), jnp.float32)
    beta = 0.1 * jax.random.normal(kb, (hidden,), jnp.float32)

    # Example wrapped `fn`: a simple Linear(hidden -> hidden), as in a
    # PreNorm-style block.
    w = jax.random.normal(kw, (hidden, hidden), jnp.float32) / (hidden ** 0.5)
    bias = 0.01 * jax.random.normal(kbias, (hidden,), jnp.float32)
    fn = lambda y: y @ w + bias

    fwd = jax.jit(lambda xx, gg, bb: layer_normal_forward(xx, gg, bb, fn))
    out = jax.block_until_ready(fwd(x, gamma, beta))

    # Pure-JAX reference check.
    mean = jnp.mean(x, axis=-1, keepdims=True)
    var = jnp.mean((x - mean) ** 2, axis=-1, keepdims=True)
    ref_norm = (x - mean) / jnp.sqrt(var + _LN_EPS) * gamma + beta
    ref = ref_norm @ w + bias

    assert out.shape == (b, l, hidden)
    assert jnp.allclose(out, ref, atol=1e-5, rtol=1e-5), (
        float(jnp.max(jnp.abs(out - ref))))
    # normalized (pre-fn) output has ~zero mean per row
    norm_only = jax.block_until_ready(
        jax.jit(layer_norm_pallas)(x, jnp.ones((hidden,)), jnp.zeros((hidden,))))
    assert jnp.allclose(jnp.mean(norm_only, axis=-1),
                        jnp.zeros((b, l)), atol=1e-5)

    print("KERNEL_OK")
</pallas_src>

<mosaic_0001>
module attributes {stable_mosaic.version = 11 : i64} {
  func.func @_layer_norm_kernel(%arg0: i32, %arg1: memref<16x32xf32, #tpu.memory_space<vmem>>, %arg2: memref<1x32xf32, #tpu.memory_space<vmem>>, %arg3: memref<1x32xf32, #tpu.memory_space<vmem>>, %arg4: memref<16x32xf32, #tpu.memory_space<vmem>>) attributes {dimension_semantics = [#tpu.dimension_semantics<parallel>], iteration_bounds = array<i64: 1>, scalar_prefetch = 0 : i64, scratch_operands = 0 : i64, tpu.core_type = #tpu.core_type<tc>, window_params = [{transform_indices = @transform_0, window_bounds = array<i64: 16, 32>}, {pipeline_mode = #tpu.pipeline_mode<synchronous>, transform_indices = @transform_1, window_bounds = array<i64: 1, 32>}, {pipeline_mode = #tpu.pipeline_mode<synchronous>, transform_indices = @transform_2, window_bounds = array<i64: 1, 32>}, {transform_indices = @transform_3, window_bounds = array<i64: 16, 32>}]} {
    %c0 = arith.constant 0 : index
    %c0_0 = arith.constant 0 : index
    %0 = vector.load %arg1[%c0, %c0_0] : memref<16x32xf32, #tpu.memory_space<vmem>>, vector<16x32xf32>
    %cst = arith.constant dense<0.000000e+00> : vector<16xf32>
    %1 = vector.multi_reduction <add>, %0, %cst [1] : vector<16x32xf32> to vector<16xf32>
    %2 = vector.shape_cast %1 : vector<16xf32> to vector<16x1xf32>
    %cst_1 = arith.constant 3.200000e+01 : f32
    %3 = vector.broadcast %cst_1 : f32 to vector<16x1xf32>
    %4 = arith.divf %2, %3 : vector<16x1xf32>
    %5 = vector.broadcast %4 : vector<16x1xf32> to vector<16x32xf32>
    %6 = arith.subf %0, %5 : vector<16x32xf32>
    %7 = arith.mulf %6, %6 : vector<16x32xf32>
    %cst_2 = arith.constant dense<0.000000e+00> : vector<16xf32>
    %8 = vector.multi_reduction <add>, %7, %cst_2 [1] : vector<16x32xf32> to vector<16xf32>
    %9 = vector.shape_cast %8 : vector<16xf32> to vector<16x1xf32>
    %cst_3 = arith.constant 3.200000e+01 : f32
    %10 = vector.broadcast %cst_3 : f32 to vector<16x1xf32>
    %11 = arith.divf %9, %10 : vector<16x1xf32>
    %cst_4 = arith.constant 9.99999974E-6 : f32
    %12 = vector.broadcast %cst_4 : f32 to vector<16x1xf32>
    %13 = arith.addf %11, %12 : vector<16x1xf32>
    %14 = math.rsqrt %13 : vector<16x1xf32>
    %15 = vector.broadcast %14 : vector<16x1xf32> to vector<16x32xf32>
    %16 = arith.mulf %6, %15 : vector<16x32xf32>
    %c0_5 = arith.constant 0 : index
    %c0_6 = arith.constant 0 : index
    %17 = vector.load %arg2[%c0_5, %c0_6] : memref<1x32xf32, #tpu.memory_space<vmem>>, vector<1x32xf32>
    %18 = vector.broadcast %17 : vector<1x32xf32> to vector<16x32xf32>
    %19 = arith.mulf %16, %18 : vector<16x32xf32>
    %c0_7 = arith.constant 0 : index
    %c0_8 = arith.constant 0 : index
    %20 = vector.load %arg3[%c0_7, %c0_8] : memref<1x32xf32, #tpu.memory_space<vmem>>, vector<1x32xf32>
    %21 = vector.broadcast %20 : vector<1x32xf32> to vector<16x32xf32>
    %22 = arith.addf %19, %21 : vector<16x32xf32>
    %c0_9 = arith.constant 0 : index
    %c0_10 = arith.constant 0 : index
    %23 = vector.load %arg4[%c0_9, %c0_10] : memref<16x32xf32, #tpu.memory_space<vmem>>, vector<16x32xf32>
    tpu.vector_store %arg4[%c0_9, %c0_10], %22 {strides = array<i32>} : memref<16x32xf32, #tpu.memory_space<vmem>>, vector<16x32xf32>,
    return
  }
  func.func @transform_0(%arg0: i32) -> (i32, i32) {
    %c0_i32 = arith.constant 0 : i32
    %c0_i32_0 = arith.constant 0 : i32
    return %arg0, %c0_i32 : i32, i32
  }
  func.func @transform_1(%arg0: i32) -> (i32, i32) {
    %c0_i32 = arith.constant 0 : i32
    %c0_i32_0 = arith.constant 0 : i32
    %c0_i32_1 = arith.constant 0 : i32
    return %c0_i32, %c0_i32_0 : i32, i32
  }
  func.func @transform_2(%arg0: i32) -> (i32, i32) {
    %c0_i32 = arith.constant 0 : i32
    %c0_i32_0 = arith.constant 0 : i32
    %c0_i32_1 = arith.constant 0 : i32
    return %c0_i32, %c0_i32_0 : i32, i32
  }
  func.func @transform_3(%arg0: i32) -> (i32, i32) {
    %c0_i32 = arith.constant 0 : i32
    %c0_i32_0 = arith.constant 0 : i32
    return %arg0, %c0_i32 : i32, i32
  }
}

</mosaic_0001>

<bundles_post_ra>
// kernel: _lambda_.1
= control target key start
LH: loop header
LB: loop body
LE: loop exit
PB: predicated region body
PF: predicated region fallthrough
CT: control target
= control target key end

     0   :  { %8 = vsyncpa [#allocation3], 0  ;;  %s114_s12 = smov [#allocation2]   ;;  %s158_s0 = inlined_call_operand.hbm [shape: f32[16,32], index: 0, kind: input, shape index: {}]   ;;  %s159_s1 = inlined_call_operand.vmem [shape: f32[1,32], index: 1, kind: input, shape index: {}]   ;;  %s160_s2 = inlined_call_operand.vmem [shape: f32[1,32], index: 2, kind: input, shape index: {}]   ;;  %s161_s3 = inlined_call_operand.vmem [shape: f32[16,32], index: 3, kind: output, shape index: {}]  }
   0x1   :  { %s14_s13 = sshll.u32 %s114_s12, 4  ;;  %s15_s13 = int_to_ptr.vmem [resolvable:$true] %s14_s13 }
   0x2   :  { %s100_s14 = scalar_lea.vmem %s15_s13, 256  ;;  %p105_p1 = scmp.lt.s32.totalorder %s15_s13, %s15_s13 }
   0x3   :  { %p101_p0 = scmp.ne.s32.totalorder %s15_s13, %s100_s14  ;;  %p106_p2 = scmp.lt.s32.totalorder %s100_s14, %s100_s14 }
   0x5   :  { %p107_p3 = por %p106_p2, %p105_p1 }
   0x7   :  { %p108_p4 = pnand %p107_p3, %p101_p0 }
   0x9   :  { %111 = shalt.err (!%p108_p4)
}
   0xa   :  { %s115_s15 = smov 128   ;;  %s116_s16 = smov 8  }
   0xb   :  { %20 = dma.hbm_to_vmem [thread:$0]  %s158_s0, 256, %s15_s13, [#allocation3], %s115_s15, %s115_s15, %s116_s16  }
   0xc   :  { %112 = dma.done.wait [#allocation3], 256  }
   0xd   :  { %113 = vsyncadd [#allocation3], 4294967040  ;;  %vm30_vm0 = vcmask 261120   ;;  %v28_v0 = vld [vmem:[#allocation2] sm:$0xff]  ;;  %v29_v1 = vld [vmem:[#allocation2 + $0x8] sm:$0xff] }
   0xe   :  { %v31_v2 = vsel %vm30_vm0, %v28_v0, 0.0  ;;  %v34_v3 = vsel %vm30_vm0, %v29_v1, 0.0  ;;  %v83_v21 = vld [vmem:[%s159_s1] ss:$0 sm:$0xff] }
   0xf   :  { %32 = vadd.xlane.f32.xlu0 %v31_v2  ;;  %v84_v23 = vld [vmem:[%s160_s2] ss:$0 sm:$0xff] }
  0x13   :  { %35 = vadd.xlane.f32.xlu0 %v34_v3 }
  0x98   :  { %v33_v4 = vpop.xlane.xlu0 %32 }
  0x99   :  { %v38_v5 = vmul.f32 0.03125, %v33_v4 }
  0x9b   :  { %v40_v6 = vsub.f32 %v28_v0, %v38_v5 }
  0x9c   :  { %v36_v7 = vpop.xlane.xlu0 %35 }
  0x9d   :  { %v39_v8 = vmul.f32 0.03125, %v36_v7  ;;  %v42_v9 = vmul.f32 %v40_v6, %v40_v6 }
  0x9f   :  { %v41_v10 = vsub.f32 %v29_v1, %v39_v8  ;;  %v44_v11 = vsel %vm30_vm0, %v42_v9, 0.0 }
  0xa0   :  { %45 = vadd.xlane.f32.xlu1 %v44_v11 }
  0xa1   :  { %v43_v12 = vmul.f32 %v41_v10, %v41_v10 }
  0xa3   :  { %v47_v13 = vsel %vm30_vm0, %v43_v12, 0.0 }
  0xa4   :  { %48 = vadd.xlane.f32.xlu1 %v47_v13 }
 0x129   :  { %v46_v14 = vpop.xlane.xlu1 %45 }
 0x12a   :  { %v50_v15 = vmul.f32 0.03125, %v46_v14 }
 0x12c   :  { %v52_v16 = vadd.f32 1e-05, %v50_v15 }
 0x12d   :  { %v49_v17 = vpop.xlane.xlu1 %48 }
 0x12e   :  { %88 = vrsqrt.f32 %v52_v16  ;;  %v51_v18 = vmul.f32 0.03125, %v49_v17 }
 0x130   :  { %v53_v19 = vadd.f32 1e-05, %v51_v18 }
 0x132   :  { %90 = vrsqrt.f32 %v53_v19 }
 0x13b   :  { %v89_v20 = vpop.eup %88 }
 0x13c   :  { %v56_v22 = vmul.f32 %v89_v20, %v40_v6 }
 0x13e   :  { %v65_v24 = vmul.f32 %v83_v21, %v56_v22 }
 0x13f   :  { %v91_v25 = vpop.eup %90 }
 0x140   :  { %v74_v26 = vadd.f32 %v84_v23, %v65_v24  ;;  %v57_v27 = vmul.f32 %v91_v25, %v41_v10 }
 0x142   :  { %76 = vst.msk [vmem:[%s161_s3] sm:$0xff] %vm30_vm0, %v74_v26  ;;  %v66_v28 = vmul.f32 %v83_v21, %v57_v27 }
 0x144   :  { %v75_v29 = vadd.f32 %v84_v23, %v66_v28 }
 0x146   :  { %77 = vst.msk [vmem:[%s161_s3 + $0x8] sm:$0xff] %vm30_vm0, %v75_v29 }
 0x147   :  { %82 = vsyncpa [#allocation3], 1 }

</bundles_post_ra>
